<compile_context>
chip_gen: v5e
topology: v5e:2x2
jax: 0.10.0
libtpu: 0.0.40
codegen_flags: <defaults>
</compile_context>

<pallas_src>
import functools

import jax
import jax.numpy as jnp
from jax.experimental import pallas as pl
from jax.experimental.pallas import tpu as pltpu


def recon_listener_kernel(vis_ref, msg_ref, wv_ref, bv_ref, wan_ref, ban_ref,
                          wat_ref, bat_ref, bd_ref, expand_ref, select_ref,
                          out_ref, *, bt, C, M, A, R, G, E, use_bf16):
    cdt = jnp.bfloat16 if use_bf16 else jnp.float32

    # --- fused visual model: one (bt*(M+C), D) @ (D, E) matmul + one tanh -----------
    emb = jnp.tanh(
        jnp.dot(vis_ref[...], wv_ref[...], preferred_element_type=jnp.float32)
        + bv_ref[...])                                        # (bt*(M+C), E) f32
    cand_emb = emb[:bt * M].reshape(bt, M, E)                 # candidates, batch-major

    # --- SharedGroupMLP (approx), fused over the C context items --------------------
    an_pre = ban_ref[...]                                     # (1, O), broadcasts below
    for c in range(C):                                        # C is tiny and static
        ctx_c = emb[bt * M + c * bt: bt * M + (c + 1) * bt]   # (bt, E), aligned slice
        an_pre = an_pre + jnp.dot(ctx_c.astype(cdt), wan_ref[c],
                                  preferred_element_type=jnp.float32)
    analogy = jnp.tanh(an_pre)                                # (bt, O = A*R*G)

    # --- all attention heads in one matmul; per-group softmax via 0/1 matrices ------
    logits = jnp.dot(msg_ref[...], wat_ref[...],
                     preferred_element_type=jnp.float32) + bat_ref[...]   # (bt, A*R)
    # Subtracting the row-global max is constant within every R-group, so each
    # group softmax is unchanged (and stays numerically safe).
    ex = jnp.exp(logits - jnp.max(logits, axis=-1, keepdims=True))
    den = jnp.dot(ex, bd_ref[...], preferred_element_type=jnp.float32)    # group sums
    attn = ex / den                                            # (bt, A*R)

    # Rule-weighted combine: expand attn to (bt, O), VPU-multiply with analogy, then
    # contract R with a 0/1 selector -> (bt, E).  No per-(a, r) slicing / concat.
    attn_o = jnp.dot(attn, expand_ref[...], preferred_element_type=jnp.float32)
    out_vec = jnp.dot(attn_o * analogy, select_ref[...],
                      preferred_element_type=jnp.float32)      # (bt, E)

    # --- dots[b, m] = <cand_emb[b, m, :], out_vec[b, :]> : VPU mul + lane reduce ----
    dots = jnp.sum(cand_emb * out_vec[:, None, :], axis=-1)    # (bt, M)
    out_ref[...] = dots.astype(out_ref.dtype)


def _auto_batch_tile(B, rows_per_b, bytes_per_b):
    """Pick bt: multiple of 8 dividing B (or B itself), visual slab <= ~2048 rows,
    per-step working set small enough to double-buffer, and >=4 grid steps when B
    allows (keeps the pipeline and v7x's two TensorCores fed)."""
    divisors = [d for d in range(8, B + 1, 8) if B % d == 0]
    if not divisors:
        return B                                        # tiny batch: single step
    def fits(d):
        return d * rows_per_b <= 2048 and 2 * d * bytes_per_b <= 24 * (1 << 20)
    fitting = [d for d in divisors if fits(d)] or [divisors[0]]
    for min_steps in (4, 2):
        cand = [d for d in fitting if B // d >= min_steps]
        if cand:
            return max(cand)
    return max(fitting)


def recon_listener(msg, ctx, cand, wv, bv, w_an, b_an, w_attn, b_attn, *,
                   symbol_attr_dim, rules_dim, batch_tile=None, use_bf16=True):
    """msg: (B, T); ctx: (B, C, D); cand: (B, M, D). Returns dots (B, M) float32."""
    B, C, D = ctx.shape
    _, M, _ = cand.shape
    D2, E = wv.shape
    assert D2 == D
    A, R = symbol_attr_dim, rules_dim
    assert E % A == 0
    G = E // A
    O = A * R * G
    T = msg.shape[1]
    assert w_an.shape == (C * E, O) and w_attn.shape == (T, A * R)

    in_dt = jnp.bfloat16 if use_bf16 else jnp.float32
    isz = jnp.dtype(in_dt).itemsize

    # Per-example bytes streamed each grid step (activations + intermediates, not weights).
    rows_per_b = M + C
    bytes_per_b = (rows_per_b * D * isz + T * isz + M * 4
                   + rows_per_b * E * 4 + 4 * O * 4)
    bt = _auto_batch_tile(B, rows_per_b, bytes_per_b) if batch_tile is None else batch_tile
    assert B % bt == 0, "batch must divide evenly into batch tiles"
    # Mosaic (8,128) rule: a tiled second-minor block dim must be a multiple of 8.
    assert bt % 8 == 0 or bt == B, "batch_tile must be a multiple of 8 (or == B)"
    nt = B // bt

    # ---- wrapper-side layout plumbing (XLA reshape/transpose/concat, done once) ----
    # Visual slab per batch tile: [bt*M candidate rows (batch-major), then C groups of
    # bt context rows] so one (bt*(M+C), D) @ (D, E) matmul embeds everything and the
    # context rows slice back out on aligned sublane offsets (multiples of bt).
    cand_t = cand.reshape(nt, bt * M, D)
    ctx_t = jnp.transpose(ctx.reshape(nt, bt, C, D), (0, 2, 1, 3)).reshape(nt, C * bt, D)
    vis = jnp.concatenate([cand_t, ctx_t], axis=1).reshape(B * (M + C), D).astype(in_dt)
    msg_in = msg.astype(in_dt)
    wv_in = wv.astype(in_dt)
    wan3 = w_an.reshape(C, E, O).astype(in_dt)          # per-context-item analogy weights
    wat_in = w_attn.astype(in_dt)
    bv_in = bv.astype(jnp.float32)
    ban_in = b_an.astype(jnp.float32)
    bat_in = b_attn.astype(jnp.float32)

    # Constant 0/1 matrices: grouped-softmax denominator broadcast, attention lane
    # expansion (A*R -> O), and the R-contraction selector (O -> E).
    ar_idx = jnp.arange(A * R)
    bd = (ar_idx[:, None] // R == ar_idx[None, :] // R).astype(jnp.float32)   # (A*R, A*R)
    o_idx = jnp.arange(O)
    expand = (o_idx[None, :] // G == ar_idx[:, None]).astype(jnp.float32)     # (A*R, O)
    e_idx = jnp.arange(E)
    select = ((o_idx[:, None] // (R * G)) * G + (o_idx[:, None] % G)
              == e_idx[None, :]).astype(jnp.float32)                          # (O, E)

    kern = functools.partial(recon_listener_kernel, bt=bt, C=C, M=M, A=A, R=R,
                             G=G, E=E, use_bf16=use_bf16)

    weight_bytes = ((D * E + C * E * O + T * A * R) * isz
                    + (E + O + A * R) * 4
                    + ((A * R) * (A * R) + (A * R) * O + O * E) * 4)
    # Generous per-step estimate (x2 for double buffering) + headroom, clamped to
    # [16 MiB, 64 MiB] so it stays within v7x's 64 MiB physical VMEM.
    vmem_est = 2 * (bt * bytes_per_b) + 2 * weight_bytes + (4 << 20)
    vmem_limit = int(min(64 << 20, max(16 << 20, 2 * vmem_est)))

    flops = 2 * B * ((M + C) * D * E + C * E * O + T * A * R
                     + (A * R) * (A * R) + (A * R) * O + O * E + M * E)
    transcendentals = B * ((M + C) * E + O + A * R)
    bytes_accessed = (vis.size + msg_in.size) * isz + weight_bytes + B * M * 4

    return pl.pallas_call(
        kern,
        out_shape=jax.ShapeDtypeStruct((B, M), jnp.float32),
        grid=(nt,),
        in_specs=[
            pl.BlockSpec((bt * (M + C), D), lambda i: (i, 0)),   # visual slab per tile
            pl.BlockSpec((bt, T), lambda i: (i, 0)),             # message embedding
            pl.BlockSpec((D, E), lambda i: (0, 0)),              # visual weight (resident)
            pl.BlockSpec((1, E), lambda i: (0, 0)),              # visual bias
            pl.BlockSpec((C, E, O), lambda i: (0, 0, 0)),        # analogy weight per item
            pl.BlockSpec((1, O), lambda i: (0, 0)),              # analogy bias
            pl.BlockSpec((T, A * R), lambda i: (0, 0)),          # stacked attn-head weights
            pl.BlockSpec((1, A * R), lambda i: (0, 0)),          # stacked attn-head biases
            pl.BlockSpec((A * R, A * R), lambda i: (0, 0)),      # grouped-softmax sums
            pl.BlockSpec((A * R, O), lambda i: (0, 0)),          # attn lane-expansion
            pl.BlockSpec((O, E), lambda i: (0, 0)),              # R-contraction selector
        ],
        out_specs=pl.BlockSpec((bt, M), lambda i: (i, 0)),       # lane-dense (B, M)
        compiler_params=pltpu.CompilerParams(
            dimension_semantics=("parallel",),                   # v7x: tiles across TCs
            vmem_limit_bytes=vmem_limit),
        cost_estimate=pl.CostEstimate(
            flops=int(flops), transcendentals=int(transcendentals),
            bytes_accessed=int(bytes_accessed)),
    )(vis, msg_in, wv_in, bv_in, wan3, ban_in, wat_in, bat_in, bd, expand, select)


def reference(msg, ctx, cand, wv, bv, w_an, b_an, w_attn, b_attn, *, A, R):
    """Pure-JAX mirror of the PyTorch forward (with the same approximations)."""
    B, C, _ = ctx.shape
    E = wv.shape[1]
    G = E // A
    ctx_emb = jnp.tanh(ctx @ wv + bv)                        # visual_model(context)
    cand_emb = jnp.tanh(cand @ wv + bv)                      # visual_model(candidates)
    an = jnp.tanh(ctx_emb.reshape(B, C * E) @ w_an + b_an)   # SharedGroupMLP approx
    an4 = an.reshape(B, A, R, G)                             # view(-1, A, R, G)
    attn = jax.nn.softmax((msg @ w_attn + b_attn).reshape(B, A, R), axis=-1)
    new_out = jnp.sum(attn[..., None] * an4, axis=2)         # matmul(w, o) per head
    out_vec = new_out.reshape(B, A * G)                      # view(-1, image_embedding_dim)
    dots = jnp.sum(cand_emb * out_vec[:, None, :], axis=-1)  # cand @ out[..., None]
    return dots


if __name__ == "__main__":
    # Small shapes consistent with the module (B large enough for a 4-step pipeline):
    B, C, M = 32, 2, 8       # batch, context items, candidates
    D = 16                   # raw input feature dim (visual/symbol input)
    E = 32                   # image_embedding_dim
    A = 4                    # symbol_attr_dim
    R = 8                    # rules_dim
    G = E // A               # per-attribute chunk of the image embedding
    T = 16                   # message_embedding_dim
    O = A * R * G            # SharedGroupMLP output dim

    key = jax.random.PRNGKey(0)
    ks = jax.random.split(key, 9)
    ctx = jax.random.normal(ks[0], (B, C, D), dtype=jnp.float32)
    cand = jax.random.normal(ks[1], (B, M, D), dtype=jnp.float32)
    msg = jax.random.normal(ks[2], (B, T), dtype=jnp.float32)

    # Parameters stored as (in, out), i.e. PyTorch Linear weight transposed.
    wv = 0.1 * jax.random.normal(ks[3], (D, E), dtype=jnp.float32)
    bv = 0.1 * jax.random.normal(ks[4], (1, E), dtype=jnp.float32)
    w_an = 0.1 * jax.random.normal(ks[5], (C * E, O), dtype=jnp.float32)
    b_an = 0.1 * jax.random.normal(ks[6], (1, O), dtype=jnp.float32)
    w_attn = 0.1 * jax.random.normal(ks[7], (T, A * R), dtype=jnp.float32)
    b_attn = 0.1 * jax.random.normal(ks[8], (1, A * R), dtype=jnp.float32)

    expected = reference(msg, ctx, cand, wv, bv, w_an, b_an, w_attn, b_attn, A=A, R=R)

    # fp32 MXU path: strict check against the pure-JAX reference.
    out_f32 = jax.block_until_ready(recon_listener(
        msg, ctx, cand, wv, bv, w_an, b_an, w_attn, b_attn,
        symbol_attr_dim=A, rules_dim=R, use_bf16=False))
    assert out_f32.shape == (B, M), out_f32.shape
    assert jnp.allclose(out_f32, expected, atol=1e-4, rtol=1e-4), "fp32 mismatch vs. reference"

    # bf16-MXU fast path (default): looser tolerance for the bf16 operand rounding.
    out_bf16 = jax.block_until_ready(recon_listener(
        msg, ctx, cand, wv, bv, w_an, b_an, w_attn, b_attn,
        symbol_attr_dim=A, rules_dim=R, use_bf16=True))
    assert out_bf16.shape == (B, M), out_bf16.shape
    assert jnp.allclose(out_bf16, expected, atol=5e-2, rtol=5e-2), "bf16 mismatch vs. reference"

    print("KERNEL_OK")
</pallas_src>

<mosaic_0001>
module attributes {stable_mosaic.version = 11 : i64} {
  func.func @recon_listener_kernel(%arg0: i32, %arg1: memref<80x16xf32, #tpu.memory_space<vmem>>, %arg2: memref<8x16xf32, #tpu.memory_space<vmem>>, %arg3: memref<16x32xf32, #tpu.memory_space<vmem>>, %arg4: memref<1x32xf32, #tpu.memory_space<vmem>>, %arg5: memref<2x32x256xf32, #tpu.memory_space<vmem>>, %arg6: memref<1x256xf32, #tpu.memory_space<vmem>>, %arg7: memref<16x32xf32, #tpu.memory_space<vmem>>, %arg8: memref<1x32xf32, #tpu.memory_space<vmem>>, %arg9: memref<32x32xf32, #tpu.memory_space<vmem>>, %arg10: memref<32x256xf32, #tpu.memory_space<vmem>>, %arg11: memref<256x32xf32, #tpu.memory_space<vmem>>, %arg12: memref<8x8xf32, #tpu.memory_space<vmem>>) attributes {dimension_semantics = [#tpu.dimension_semantics<parallel>], iteration_bounds = array<i64: 4>, scalar_prefetch = 0 : i64, scratch_operands = 0 : i64, tpu.core_type = #tpu.core_type<tc>, window_params = [{transform_indices = @transform_0, window_bounds = array<i64: 80, 16>}, {transform_indices = @transform_1, window_bounds = array<i64: 8, 16>}, {pipeline_mode = #tpu.pipeline_mode<synchronous>, transform_indices = @transform_2, window_bounds = array<i64: 16, 32>}, {pipeline_mode = #tpu.pipeline_mode<synchronous>, transform_indices = @transform_3, window_bounds = array<i64: 1, 32>}, {pipeline_mode = #tpu.pipeline_mode<synchronous>, transform_indices = @transform_4, window_bounds = array<i64: 2, 32, 256>}, {pipeline_mode = #tpu.pipeline_mode<synchronous>, transform_indices = @transform_5, window_bounds = array<i64: 1, 256>}, {pipeline_mode = #tpu.pipeline_mode<synchronous>, transform_indices = @transform_6, window_bounds = array<i64: 16, 32>}, {pipeline_mode = #tpu.pipeline_mode<synchronous>, transform_indices = @transform_7, window_bounds = array<i64: 1, 32>}, {pipeline_mode = #tpu.pipeline_mode<synchronous>, transform_indices = @transform_8, window_bounds = array<i64: 32, 32>}, {pipeline_mode = #tpu.pipeline_mode<synchronous>, transform_indices = @transform_9, window_bounds = array<i64: 32, 256>}, {pipeline_mode = #tpu.pipeline_mode<synchronous>, transform_indices = @transform_10, window_bounds = array<i64: 256, 32>}, {transform_indices = @transform_11, window_bounds = array<i64: 8, 8>}]} {
    %c0 = arith.constant 0 : index
    %c0_0 = arith.constant 0 : index
    %0 = vector.load %arg1[%c0, %c0_0] : memref<80x16xf32, #tpu.memory_space<vmem>>, vector<80x16xf32>
    %c0_1 = arith.constant 0 : index
    %c0_2 = arith.constant 0 : index
    %1 = vector.load %arg3[%c0_1, %c0_2] : memref<16x32xf32, #tpu.memory_space<vmem>>, vector<16x32xf32>
    %cst = arith.constant dense<0.000000e+00> : vector<80x32xf32>
    %2 = tpu.matmul %0, %1, %cst {dimension_numbers = #tpu.dot_dimension_numbers<[1], [0], [0], [1], [0, 0, 1, 1], [], []>} : vector<80x16xf32>, vector<16x32xf32>, vector<80x32xf32> -> vector<80x32xf32>
    %c0_3 = arith.constant 0 : index
    %c0_4 = arith.constant 0 : index
    %3 = vector.load %arg4[%c0_3, %c0_4] : memref<1x32xf32, #tpu.memory_space<vmem>>, vector<1x32xf32>
    %4 = vector.broadcast %3 : vector<1x32xf32> to vector<80x32xf32>
    %5 = arith.addf %2, %4 : vector<80x32xf32>
    %6 = math.tanh %5 : vector<80x32xf32>
    %7 = vector.extract_strided_slice %6 {offsets = [0, 0], sizes = [64, 32], strides = [1, 1]} : vector<80x32xf32> to vector<64x32xf32>
    %8 = vector.shape_cast %7 : vector<64x32xf32> to vector<8x8x32xf32>
    %c0_5 = arith.constant 0 : index
    %c0_6 = arith.constant 0 : index
    %9 = vector.load %arg6[%c0_5, %c0_6] : memref<1x256xf32, #tpu.memory_space<vmem>>, vector<1x256xf32>
    %10 = vector.extract_strided_slice %6 {offsets = [64, 0], sizes = [8, 32], strides = [1, 1]} : vector<80x32xf32> to vector<8x32xf32>
    %c0_7 = arith.constant 0 : index
    %c0_8 = arith.constant 0 : index
    %c0_9 = arith.constant 0 : index
    %11 = vector.load %arg5[%c0_7, %c0_8, %c0_9] : memref<2x32x256xf32, #tpu.memory_space<vmem>>, vector<1x32x256xf32>
    %12 = vector.shape_cast %11 : vector<1x32x256xf32> to vector<32x256xf32>
    %cst_10 = arith.constant dense<0.000000e+00> : vector<8x256xf32>
    %13 = tpu.matmul %10, %12, %cst_10 {dimension_numbers = #tpu.dot_dimension_numbers<[1], [0], [0], [1], [0, 0, 1, 1], [], []>} : vector<8x32xf32>, vector<32x256xf32>, vector<8x256xf32> -> vector<8x256xf32>
    %14 = vector.broadcast %9 : vector<1x256xf32> to vector<8x256xf32>
    %15 = arith.addf %14, %13 : vector<8x256xf32>
    %16 = vector.extract_strided_slice %6 {offsets = [72, 0], sizes = [8, 32], strides = [1, 1]} : vector<80x32xf32> to vector<8x32xf32>
    %c1 = arith.constant 1 : index
    %c0_11 = arith.constant 0 : index
    %c0_12 = arith.constant 0 : index
    %17 = vector.load %arg5[%c1, %c0_11, %c0_12] : memref<2x32x256xf32, #tpu.memory_space<vmem>>, vector<1x32x256xf32>
    %18 = vector.shape_cast %17 : vector<1x32x256xf32> to vector<32x256xf32>
    %cst_13 = arith.constant dense<0.000000e+00> : vector<8x256xf32>
    %19 = tpu.matmul %16, %18, %cst_13 {dimension_numbers = #tpu.dot_dimension_numbers<[1], [0], [0], [1], [0, 0, 1, 1], [], []>} : vector<8x32xf32>, vector<32x256xf32>, vector<8x256xf32> -> vector<8x256xf32>
    %20 = arith.addf %15, %19 : vector<8x256xf32>
    %21 = math.tanh %20 : vector<8x256xf32>
    %c0_14 = arith.constant 0 : index
    %c0_15 = arith.constant 0 : index
    %22 = vector.load %arg2[%c0_14, %c0_15] : memref<8x16xf32, #tpu.memory_space<vmem>>, vector<8x16xf32>
    %c0_16 = arith.constant 0 : index
    %c0_17 = arith.constant 0 : index
    %23 = vector.load %arg7[%c0_16, %c0_17] : memref<16x32xf32, #tpu.memory_space<vmem>>, vector<16x32xf32>
    %cst_18 = arith.constant dense<0.000000e+00> : vector<8x32xf32>
    %24 = tpu.matmul %22, %23, %cst_18 {dimension_numbers = #tpu.dot_dimension_numbers<[1], [0], [0], [1], [0, 0, 1, 1], [], []>} : vector<8x16xf32>, vector<16x32xf32>, vector<8x32xf32> -> vector<8x32xf32>
    %c0_19 = arith.constant 0 : index
    %c0_20 = arith.constant 0 : index
    %25 = vector.load %arg8[%c0_19, %c0_20] : memref<1x32xf32, #tpu.memory_space<vmem>>, vector<1x32xf32>
    %26 = vector.broadcast %25 : vector<1x32xf32> to vector<8x32xf32>
    %27 = arith.addf %24, %26 : vector<8x32xf32>
    %cst_21 = arith.constant dense<0xFF800000> : vector<8xf32>
    %28 = vector.multi_reduction <maximumf>, %27, %cst_21 [1] : vector<8x32xf32> to vector<8xf32>
    %29 = vector.shape_cast %28 : vector<8xf32> to vector<8x1xf32>
    %30 = vector.broadcast %29 : vector<8x1xf32> to vector<8x32xf32>
    %31 = arith.subf %27, %30 : vector<8x32xf32>
    %32 = math.exp %31 : vector<8x32xf32>
    %c0_22 = arith.constant 0 : index
    %c0_23 = arith.constant 0 : index
    %33 = vector.load %arg9[%c0_22, %c0_23] : memref<32x32xf32, #tpu.memory_space<vmem>>, vector<32x32xf32>
    %cst_24 = arith.constant dense<0.000000e+00> : vector<8x32xf32>
    %34 = tpu.matmul %32, %33, %cst_24 {dimension_numbers = #tpu.dot_dimension_numbers<[1], [0], [0], [1], [0, 0, 1, 1], [], []>} : vector<8x32xf32>, vector<32x32xf32>, vector<8x32xf32> -> vector<8x32xf32>
    %35 = arith.divf %32, %34 : vector<8x32xf32>
    %c0_25 = arith.constant 0 : index
    %c0_26 = arith.constant 0 : index
    %36 = vector.load %arg10[%c0_25, %c0_26] : memref<32x256xf32, #tpu.memory_space<vmem>>, vector<32x256xf32>
    %cst_27 = arith.constant dense<0.000000e+00> : vector<8x256xf32>
    %37 = tpu.matmul %35, %36, %cst_27 {dimension_numbers = #tpu.dot_dimension_numbers<[1], [0], [0], [1], [0, 0, 1, 1], [], []>} : vector<8x32xf32>, vector<32x256xf32>, vector<8x256xf32> -> vector<8x256xf32>
    %38 = arith.mulf %37, %21 : vector<8x256xf32>
    %c0_28 = arith.constant 0 : index
    %c0_29 = arith.constant 0 : index
    %39 = vector.load %arg11[%c0_28, %c0_29] : memref<256x32xf32, #tpu.memory_space<vmem>>, vector<256x32xf32>
    %cst_30 = arith.constant dense<0.000000e+00> : vector<8x32xf32>
    %40 = tpu.matmul %38, %39, %cst_30 {dimension_numbers = #tpu.dot_dimension_numbers<[1], [0], [0], [1], [0, 0, 1, 1], [], []>} : vector<8x256xf32>, vector<256x32xf32>, vector<8x32xf32> -> vector<8x32xf32>
    %41 = vector.shape_cast %40 : vector<8x32xf32> to vector<8x1x32xf32>
    %42 = vector.broadcast %41 : vector<8x1x32xf32> to vector<8x8x32xf32>
    %43 = arith.mulf %8, %42 : vector<8x8x32xf32>
    %cst_31 = arith.constant dense<0.000000e+00> : vector<8x8xf32>
    %44 = vector.multi_reduction <add>, %43, %cst_31 [2] : vector<8x8x32xf32> to vector<8x8xf32>
    %c0_32 = arith.constant 0 : index
    %c0_33 = arith.constant 0 : index
    %45 = vector.load %arg12[%c0_32, %c0_33] : memref<8x8xf32, #tpu.memory_space<vmem>>, vector<8x8xf32>
    tpu.vector_store %arg12[%c0_32, %c0_33], %44 {strides = array<i32>} : memref<8x8xf32, #tpu.memory_space<vmem>>, vector<8x8xf32>,
    return
  }
  func.func @transform_0(%arg0: i32) -> (i32, i32) {
    %c0_i32 = arith.constant 0 : i32
    %c0_i32_0 = arith.constant 0 : i32
    return %arg0, %c0_i32 : i32, i32
  }
  func.func @transform_1(%arg0: i32) -> (i32, i32) {
    %c0_i32 = arith.constant 0 : i32
    %c0_i32_0 = arith.constant 0 : i32
    return %arg0, %c0_i32 : i32, i32
  }
  func.func @transform_2(%arg0: i32) -> (i32, i32) {
    %c0_i32 = arith.constant 0 : i32
    %c0_i32_0 = arith.constant 0 : i32
    %c0_i32_1 = arith.constant 0 : i32
    return %c0_i32, %c0_i32_0 : i32, i32
  }
  func.func @transform_3(%arg0: i32) -> (i32, i32) {
    %c0_i32 = arith.constant 0 : i32
    %c0_i32_0 = arith.constant 0 : i32
    %c0_i32_1 = arith.constant 0 : i32
    return %c0_i32, %c0_i32_0 : i32, i32
  }
  func.func @transform_4(%arg0: i32) -> (i32, i32, i32) {
    %c0_i32 = arith.constant 0 : i32
    %c0_i32_0 = arith.constant 0 : i32
    %c0_i32_1 = arith.constant 0 : i32
    %c0_i32_2 = arith.constant 0 : i32
    return %c0_i32, %c0_i32_0, %c0_i32_1 : i32, i32, i32
  }
  func.func @transform_5(%arg0: i32) -> (i32, i32) {
    %c0_i32 = arith.constant 0 : i32
    %c0_i32_0 = arith.constant 0 : i32
    %c0_i32_1 = arith.constant 0 : i32
    return %c0_i32, %c0_i32_0 : i32, i32
  }
  func.func @transform_6(%arg0: i32) -> (i32, i32) {
    %c0_i32 = arith.constant 0 : i32
    %c0_i32_0 = arith.constant 0 : i32
    %c0_i32_1 = arith.constant 0 : i32
    return %c0_i32, %c0_i32_0 : i32, i32
  }
  func.func @transform_7(%arg0: i32) -> (i32, i32) {
    %c0_i32 = arith.constant 0 : i32
    %c0_i32_0 = arith.constant 0 : i32
    %c0_i32_1 = arith.constant 0 : i32
    return %c0_i32, %c0_i32_0 : i32, i32
  }
  func.func @transform_8(%arg0: i32) -> (i32, i32) {
    %c0_i32 = arith.constant 0 : i32
    %c0_i32_0 = arith.constant 0 : i32
    %c0_i32_1 = arith.constant 0 : i32
    return %c0_i32, %c0_i32_0 : i32, i32
  }
  func.func @transform_9(%arg0: i32) -> (i32, i32) {
    %c0_i32 = arith.constant 0 : i32
    %c0_i32_0 = arith.constant 0 : i32
    %c0_i32_1 = arith.constant 0 : i32
    return %c0_i32, %c0_i32_0 : i32, i32
  }
  func.func @transform_10(%arg0: i32) -> (i32, i32) {
    %c0_i32 = arith.constant 0 : i32
    %c0_i32_0 = arith.constant 0 : i32
    %c0_i32_1 = arith.constant 0 : i32
    return %c0_i32, %c0_i32_0 : i32, i32
  }
  func.func @transform_11(%arg0: i32) -> (i32, i32) {
    %c0_i32 = arith.constant 0 : i32
    %c0_i32_0 = arith.constant 0 : i32
    return %arg0, %c0_i32 : i32, i32
  }
}

</mosaic_0001>

<bundles_post_ra>
// kernel: tpu_custom_call.1
= control target key start
LH: loop header
LB: loop body
LE: loop exit
PB: predicated region body
PF: predicated region fallthrough
CT: control target
= control target key end

     0   :  { %s1127_s17 = smov 0   ;;  %s1427_s0 = inlined_call_operand.vmem [shape: f32[320,16], index: 0, kind: input, shape index: {}]   ;;  %s1428_s1 = inlined_call_operand.vmem [shape: f32[32,16], index: 1, kind: input, shape index: {}]   ;;  %s1429_s2 = inlined_call_operand.vmem [shape: f32[16,32], index: 2, kind: input, shape index: {}]   ;;  %s1430_s3 = inlined_call_operand.vmem [shape: f32[1,32], index: 3, kind: input, shape index: {}]   ;;  %s1431_s4 = inlined_call_operand.vmem [shape: f32[2,32,256], index: 4, kind: input, shape index: {}]   ;;  %s1432_s5 = inlined_call_operand.vmem [shape: f32[1,256], index: 5, kind: input, shape index: {}]   ;;  %s1433_s6 = inlined_call_operand.vmem [shape: f32[16,32], index: 6, kind: input, shape index: {}]   ;;  %s1434_s7 = inlined_call_operand.vmem [shape: f32[1,32], index: 7, kind: input, shape index: {}]   ;;  %s1435_s8 = inlined_call_operand.vmem [shape: f32[32,32], index: 8, kind: input, shape index: {}]   ;;  %s1436_s9 = inlined_call_operand.vmem [shape: f32[32,256], index: 9, kind: input, shape index: {}]   ;;  %s1437_s10 = inlined_call_operand.vmem [shape: f32[256,32], index: 10, kind: input, shape index: {}]   ;;  %s1438_s11 = inlined_call_operand.vmem [shape: f32[32,8], index: 11, kind: output, shape index: {}]  }
   0x1 LB: > { %s1133_s18 = sadd.s32 4294967295, %s1065_s17   ;;  %p987_p0 = scmp.ge.s32.totalorder %s1065_s17, 1  ;;  %s1065_s17 = sphi %s1127_s17, %s21_s17  }
   0x2   : > { %p347_p1 = scmp.lt.s32.totalorder %s1065_s17, 5 }
   0x4   : > { %p348_p2 = pnand %p987_p0, %p347_p1 }
   0x5   : > { %s390_s23 = smul.u32 (!%p348_p2), 10, %s1133_s18  ;;  %p396_p4 = scmp.lt.s32.totalorder (!%p348_p2), %s1133_s18, 3 }
   0x6   : > { %351 = sbr.rel (%p348_p2) target bundleno = 999 (0x3e7), region = 64 }
   0x7   : > { %p391_p3 = scmp.lt.s32.totalorder (!%p348_p2), %s390_s23, 39 }
   0xb   : > { %v415_v0 = vld [vmem:[%s1429_s2 + $0x8] sm:$0xff]  ;;  %v414_v1 = vld [vmem:[%s1429_s2] sm:$0xff]  ;;  %v515_v2 = vld [vmem:[%s1431_s4 + $0x30] sm:$0xff]  ;;  %s1440_s23 = smov (!%p391_p3, %s390_s23), 39  ;;  %vm420_vm0 = vcmask 130048   ;;  %vm517_vm1 = vcmask 261120  }
   0xc   : > { %1019 = vmatpush.msra.mxu2 %v415_v0  ;;  %465 = vmatpush.msra.mxu0 %v415_v0  ;;  %s988_s26 = sshll.u32 %s1440_s23, 3  ;;  %v513_v6 = vld [vmem:[%s1431_s4 + $0x20] sm:$0xff]  ;;  %v511_v7 = vld [vmem:[%s1431_s4 + $0x10] sm:$0xff]  ;;  %v516_v9 = vld [vmem:[%s1431_s4 + $0x38] sm:$0xff]  ;;  %s1442_s18 = smov (!%p396_p4, %s1133_s18), 3  ;;  %vm901_vm6 = vcmask 1041409  }
   0xd   : > { %s1150_s29 = scalar_lea.vmem %s1427_s0, %s988_s26  ;;  %v509_v8 = vld [vmem:[%s1431_s4] sm:$0xff]  ;;  %v1009_v10 = vld [vmem:[%s1431_s4 + $0x70] sm:$0xff]  ;;  %v514_v11 = vld [vmem:[%s1431_s4 + $0x28] sm:$0xff]  ;;  %s989_s15 = sshll.u32 %s1442_s18, 3  ;;  %vm903_vm7 = vcmask 1042434   ;;  %vm905_vm8 = vcmask 1043459  }
   0xe   : > { %1020 = vmatpush.msra.mxu2 %v414_v1  ;;  %466 = vmatpush.msra.mxu0 %v414_v1  ;;  %v411_v3 = vld [vmem:[%s1150_s29 + $0x38] sm:$0xff]  ;;  %v412_v4 = vld [vmem:[%s1150_s29 + $0x40] sm:$0xff]  ;;  %v413_v5 = vld [vmem:[%s1150_s29 + $0x48] sm:$0xff]  ;;  %s399_s20 = scalar_lea.vmem %s1428_s1, %s989_s15  ;;  %vm907_vm9 = vcmask 1044484   ;;  %vm909_vm10 = vcmask 1045509   ;;  %vm911_vm11 = vcmask 1046534   ;;  %s403_s24 = scalar_lea.vmem %s1438_s11, %s989_s15 }
   0xf   : > { %998 = vmatmul.msk.f32.vlgmr.msra.gmra.mxu2 %vm420_vm0, %v411_v3  ;;  %592 = vmatpush.msra.mxu3 %v1009_v10  ;;  %v1007_v12 = vld [vmem:[%s1431_s4 + $0x60] sm:$0xff]  ;;  %v512_v13 = vld [vmem:[%s1431_s4 + $0x18] sm:$0xff]  ;;  %v1005_v14 = vld [vmem:[%s1431_s4 + $0x50] sm:$0xff]  ;;  %vm913_vm12 = vcmask 1047559   ;;  %vm916_vm13 = vcmask 64512  }
  0x10   : > { %533 = vmatpush.msrb.mxu2 %v515_v2  ;;  %v510_v15 = vld [vmem:[%s1431_s4 + $0x8] sm:$0xff]  ;;  %v1003_v16 = vld [vmem:[%s1431_s4 + $0x40] sm:$0xff]  ;;  %v1010_v17 = vld [vmem:[%s1431_s4 + $0x78] sm:$0xff] }
  0x11   : > { %593 = vmatpush.msra.mxu3 %v1007_v12  ;;  %v1008_v18 = vld [vmem:[%s1431_s4 + $0x68] sm:$0xff]  ;;  %612 = vmatpush.msra.mxu1 %v1010_v17  ;;  %v1006_v19 = vld [vmem:[%s1431_s4 + $0x58] sm:$0xff]  ;;  %v1208_v22 = vld [vmem:[%s1430_s3] ss:$0 sm:$0xff] }
  0x12   : > { %534 = vmatpush.msrb.mxu2 %v513_v6  ;;  %v1004_v20 = vld [vmem:[%s1431_s4 + $0x48] sm:$0xff]  ;;  %v625_v29 = vld [vmem:[%s1433_s6] sm:$0xff]  ;;  %v663_v38 = vld [vmem:[%s1435_s8 + $0x18] sm:$0xff] }
  0x13   : > { %594 = vmatpush.msra.mxu3 %v1005_v14  ;;  %613 = vmatpush.msra.mxu1 %v1008_v18  ;;  %v626_v26 = vld [vmem:[%s1433_s6 + $0x8] sm:$0xff]  ;;  %v624_v31 = vld [vmem:[%s399_s20] sm:$0xff]  ;;  %v662_v39 = vld [vmem:[%s1435_s8 + $0x10] sm:$0xff] }
  0x14   : > { %535 = vmatpush.msrb.mxu2 %v511_v7  ;;  %v1030_v34 = vld [vmem:[%s1434_s7] ss:$0 sm:$0xff]  ;;  %v661_v40 = vld [vmem:[%s1435_s8 + $0x8] sm:$0xff]  ;;  %v708_v46 = vld [vmem:[%s1436_s9 + $0x30] sm:$0xff] }
  0x15   : > { %595 = vmatpush.msra.mxu3 %v1003_v16  ;;  %614 = vmatpush.msra.mxu1 %v1006_v19  ;;  %v660_v41 = vld [vmem:[%s1435_s8] sm:$0xff]  ;;  %v709_v47 = vld [vmem:[%s1436_s9 + $0x38] sm:$0xff]  ;;  %v707_v49 = vld [vmem:[%s1436_s9 + $0x28] sm:$0xff] }
  0x16   : > { %536 = vmatpush.msrb.mxu2 %v509_v8  ;;  %v706_v48 = vld [vmem:[%s1436_s9 + $0x20] sm:$0xff]  ;;  %v704_v50 = vld [vmem:[%s1436_s9 + $0x10] sm:$0xff]  ;;  %v705_v51 = vld [vmem:[%s1436_s9 + $0x18] sm:$0xff] }
  0x17   : > { %999 = vmatmul.msk.f32.gmra.mxu2 %vm420_vm0, %v412_v4  ;;  %615 = vmatpush.msra.mxu1 %v1004_v20  ;;  %v702_v52 = vld [vmem:[%s1436_s9] sm:$0xff]  ;;  %v703_v53 = vld [vmem:[%s1436_s9 + $0x8] sm:$0xff]  ;;  %v770_v55 = vld [vmem:[%s1437_s10 + $0x78] sm:$0xff] }
  0x18   : > { %553 = vmatpush.msra.mxu2 %v516_v9  ;;  %679 = vmatpush.msrb.mxu3 %v663_v38  ;;  %v404_v54 = vld [vmem:[%s1150_s29] sm:$0xff]  ;;  %v769_v56 = vld [vmem:[%s1437_s10 + $0x70] sm:$0xff]  ;;  %v768_v57 = vld [vmem:[%s1437_s10 + $0x68] sm:$0xff] }
  0x19   : > { %725 = vmatpush.msrb.mxu1 %v708_v46  ;;  %991 = vmatmul.msk.f32.vlgmr.msra.gmra.mxu0 %vm420_vm0, %v404_v54  ;;  %v786_v58 = vld [vmem:[%s1437_s10 + $0xf8] sm:$0xff]  ;;  %v785_v59 = vld [vmem:[%s1437_s10 + $0xf0] sm:$0xff]  ;;  %v767_v61 = vld [vmem:[%s1437_s10 + $0x60] sm:$0xff] }
  0x1a   : > { %554 = vmatpush.msra.mxu2 %v514_v11  ;;  %680 = vmatpush.msrb.mxu3 %v662_v39  ;;  %v784_v62 = vld [vmem:[%s1437_s10 + $0xe8] sm:$0xff]  ;;  %v766_v0 = vld [vmem:[%s1437_s10 + $0x58] sm:$0xff]  ;;  %v783_v1 = vld [vmem:[%s1437_s10 + $0xe0] sm:$0xff] }
  0x1b   : > { %726 = vmatpush.msrb.mxu1 %v706_v48  ;;  %v405_v63 = vld [vmem:[%s1150_s29 + $0x8] sm:$0xff]  ;;  %v765_v2 = vld [vmem:[%s1437_s10 + $0x50] sm:$0xff]  ;;  %v782_v3 = vld [vmem:[%s1437_s10 + $0xd8] sm:$0xff] }
  0x1c   : > { %555 = vmatpush.msra.mxu2 %v512_v13  ;;  %681 = vmatpush.msrb.mxu3 %v661_v40  ;;  %v764_v4 = vld [vmem:[%s1437_s10 + $0x48] sm:$0xff]  ;;  %v763_v7 = vld [vmem:[%s1437_s10 + $0x40] sm:$0xff]  ;;  %v406_v9 = vld [vmem:[%s1150_s29 + $0x10] sm:$0xff] }
  0x1d   : > { %727 = vmatpush.msrb.mxu1 %v704_v50  ;;  %v780_v8 = vld [vmem:[%s1437_s10 + $0xc8] sm:$0xff]  ;;  %v762_v10 = vld [vmem:[%s1437_s10 + $0x38] sm:$0xff]  ;;  %v779_v11 = vld [vmem:[%s1437_s10 + $0xc0] sm:$0xff] }
  0x1e   : > { %556 = vmatpush.msra.mxu2 %v510_v15  ;;  %682 = vmatpush.msrb.mxu3 %v660_v41  ;;  %v761_v12 = vld [vmem:[%s1437_s10 + $0x30] sm:$0xff]  ;;  %v778_v13 = vld [vmem:[%s1437_s10 + $0xb8] sm:$0xff]  ;;  %v760_v14 = vld [vmem:[%s1437_s10 + $0x28] sm:$0xff] }
  0x1f   : > { %1000 = vmatmul.msk.f32.gmra.mxu2 %vm420_vm0, %v413_v5  ;;  %728 = vmatpush.msrb.mxu1 %v702_v52  ;;  %v781_v5 = vld [vmem:[%s1437_s10 + $0xd0] sm:$0xff]  ;;  %v759_v18 = vld [vmem:[%s1437_s10 + $0x20] sm:$0xff]  ;;  %v776_v19 = vld [vmem:[%s1437_s10 + $0xa8] sm:$0xff] }
  0x20   : > { %v777_v16 = vld [vmem:[%s1437_s10 + $0xb0] sm:$0xff]  ;;  %v756_v38 = vld [vmem:[%s1437_s10 + $0x8] sm:$0xff]  ;;  %v775_v39 = vld [vmem:[%s1437_s10 + $0xa0] sm:$0xff] }
  0x21   : > { %992 = vmatmul.msk.f32.gmra.mxu0 %vm420_vm0, %v405_v63  ;;  %v755_v40 = vld [vmem:[%s1437_s10] sm:$0xff]  ;;  %v774_v41 = vld [vmem:[%s1437_s10 + $0x98] sm:$0xff] }
  0x22   : > { %v508_v46 = vld [vmem:[%s1432_s5] sm:$0x3] }
  0x29   : > { %993 = vmatmul.msk.f32.gmra.mxu0 %vm420_vm0, %v406_v9 }
  0x92   : > { %v1203_v21 = vpop.f32.mrf.mxu2 }
  0x9a   : > { %v492_v23 = vpop.f32.mrf.mxu2 }
  0x9b   : > { %v493_v24 = vadd.f32 %v1208_v22, %v492_v23  ;;  %v407_v23 = vld [vmem:[%s1150_s29 + $0x18] sm:$0xff] }
  0x9c   : > { %994 = vmatmul.msk.f32.gmra.mxu0 %vm420_vm0, %v407_v23 }
  0x9d   : > { %1031 = vtanh.f32 %v493_v24  ;;  %v758_v24 = vld [vmem:[%s1437_s10 + $0x18] sm:$0xff] }
  0xa2   : > { %v495_v25 = vpop.f32.mrf.mxu2 }
  0xa3   : > { %v1032_v27 = vpop.eup %1031  ;;  %v496_v28 = vadd.f32 %v1208_v22, %v495_v25 }
  0xa4   : > { %1001 = vmatmul.msk.f32.vlgmr.msrb.gmra.mxu2 %vm517_vm1, %v1032_v27 }
  0xa5   : > { %1033 = vtanh.f32 %v496_v28  ;;  %648 = vmatpush.msrb.mxu2 %v626_v26  ;;  %v757_v28 = vld [vmem:[%s1437_s10 + $0x10] sm:$0xff] }
  0xa7   : > { %649 = vmatpush.msrb.mxu2 %v625_v29 }
  0xab   : > { %v1034_v30 = vpop.eup %1033 }
  0xac   : > { %1002 = vmatmul.msk.f32.vlgmr.msra.gmra.mxu2 %vm517_vm1, %v1032_v27  ;;  %1011 = vmatmul.msk.f32.vlgmr.msra.gmra.mxu3 %vm517_vm1, %v1034_v30 }
  0xad   : > { %1012 = vmatmul.msk.f32.vlgmr.msra.gmra.mxu1 %vm517_vm1, %v1034_v30  ;;  %745 = vmatpush.msra.mxu2 %v709_v47  ;;  %v562_v47 = vperm.slane %v508_v46, 0 }
  0xae   : > { %787 = vmatpush.msra.mxu3 %v770_v55  ;;  %807 = vmatpush.msra.mxu1 %v786_v58 }
  0xaf   : > { %746 = vmatpush.msra.mxu2 %v707_v49  ;;  %v563_v49 = vperm.slane %v508_v46, 1 }
  0xb0   : > { %788 = vmatpush.msra.mxu3 %v769_v56  ;;  %808 = vmatpush.msra.mxu1 %v785_v59 }
  0xb1   : > { %747 = vmatpush.msra.mxu2 %v705_v51 }
  0xb2   : > { %789 = vmatpush.msra.mxu3 %v768_v57  ;;  %809 = vmatpush.msra.mxu1 %v784_v62 }
  0xb3   : > { %748 = vmatpush.msra.mxu2 %v703_v53 }
  0xb4   : > { %1013 = vmatmul.msk.f32.vlgmr.msrb.gmra.mxu2 %vm420_vm0, %v624_v31  ;;  %790 = vmatpush.msra.mxu3 %v767_v61  ;;  %v468_v61 = vpop.f32.mrf.mxu0 }
  0xb5   : > { %810 = vmatpush.msra.mxu1 %v783_v1 }
  0xb6   : > { %791 = vmatpush.msra.mxu3 %v766_v0 }
  0xb7   : > { %811 = vmatpush.msra.mxu1 %v782_v3 }
  0xb8   : > { %792 = vmatpush.msra.mxu3 %v765_v2 }
  0xb9   : > { %812 = vmatpush.msra.mxu1 %v781_v5 }
  0xba   : > { %793 = vmatpush.msra.mxu3 %v764_v4 }
  0xbb   : > { %813 = vmatpush.msra.mxu1 %v780_v8 }
  0xbc   : > { %794 = vmatpush.msra.mxu3 %v763_v7  ;;  %v471_v62 = vpop.f32.mrf.mxu0 }
  0xbd   : > { %814 = vmatpush.msra.mxu1 %v779_v11 }
  0xbe   : > { %795 = vmatpush.msra.mxu3 %v762_v10 }
  0xbf   : > { %815 = vmatpush.msra.mxu1 %v778_v13 }
  0xc0   : > { %796 = vmatpush.msra.mxu3 %v761_v12 }
  0xc1   : > { %816 = vmatpush.msra.mxu1 %v777_v16 }
  0xc2   : > { %797 = vmatpush.msra.mxu3 %v760_v14 }
  0xc3   : > { %817 = vmatpush.msra.mxu1 %v776_v19 }
  0xc4   : > { %798 = vmatpush.msra.mxu3 %v759_v18 }
  0xc5   : > { %818 = vmatpush.msra.mxu1 %v775_v39 }
  0xc6   : > { %799 = vmatpush.msra.mxu3 %v758_v24 }
  0xc7   : > { %819 = vmatpush.msra.mxu1 %v774_v41 }
  0xc8   : > { %800 = vmatpush.msra.mxu3 %v757_v28 }
  0xca   : > { %801 = vmatpush.msra.mxu3 %v756_v38 }
  0xcc   : > { %802 = vmatpush.msra.mxu3 %v755_v40 }
 0x127   : > { %v1233_v32 = vpop.f32.mrf.mxu2 }
 0x128   : > { %v566_v48 = vadd.f32 %v562_v47, %v1233_v32  ;;  %v474_v32 = vpop.f32.mrf.mxu0 }
 0x129   : > { %v475_v8 = vadd.f32 %v1208_v22, %v474_v32 }
 0x12a   : > { %v617_v52 = vpop.f32.mrf.mxu1 }
 0x12f   : > { %v1235_v33 = vpop.f32.mrf.mxu2  ;;  %v1298_v60 = vpop.f32.mrf.mxu3 }
 0x130   : > { %v620_v50 = vadd.f32 %v1298_v60, %v566_v48  ;;  %v567_v51 = vadd.f32 %v563_v49, %v1235_v33  ;;  %v477_v63 = vpop.f32.mrf.mxu0  ;;  %v469_v60 = vadd.f32 %v1208_v22, %v468_v61  ;;  %v472_v33 = vadd.f32 %v1208_v22, %v471_v62 }
 0x131   : > { %v478_v2 = vadd.f32 %v1208_v22, %v477_v63 }
 0x132   : > { %v621_v53 = vadd.f32 %v617_v52, %v567_v51 }
 0x137   : > { %v651_v35 = vpop.f32.mrf.mxu2 }
 0x138   : > { %v652_v36 = vadd.f32 %v1030_v34, %v651_v35 }
 0x13a   : > { %v654_v37 = vsel %vm517_vm1, %v652_v36, -inf }
 0x13b   : > { %655 = vmax.xlane.f32.xlu0 %v654_v37  ;;  %v409_v37 = vld [vmem:[%s1150_s29 + $0x28] sm:$0xff] }
 0x1ae   : > { %v656_v42 = vpop.xlane.xlu0 %655 }
 0x1af   : > { %v657_v43 = vsub.f32 %v652_v36, %v656_v42  ;;  %v408_v36 = vld [vmem:[%s1150_s29 + $0x20] sm:$0xff]  ;;  %v773_v42 = vld [vmem:[%s1437_s10 + $0x90] sm:$0xff] }
 0x1b0   : > { %995 = vmatmul.msk.f32.gmra.mxu0 %vm420_vm0, %v408_v36  ;;  %820 = vmatpush.msra.mxu1 %v773_v42 }
 0x1b1   : > { %v658_v44 = vmul.f32 1.442695, %v657_v43  ;;  %v410_v43 = vld [vmem:[%s1150_s29 + $0x30] sm:$0xff] }
 0x1b3   : > { %1035 = vpow2.f32 %v658_v44  ;;  %v772_v44 = vld [vmem:[%s1437_s10 + $0x88] sm:$0xff] }
 0x1b4   : > { %821 = vmatpush.msra.mxu1 %v772_v44 }
 0x1b8   : > { %996 = vmatmul.msk.f32.gmra.mxu0 %vm420_vm0, %v409_v37  ;;  %v490_v37 = vadd.f32 %v1208_v22, %v1203_v21 }
 0x1b9   : > { %v1253_v45 = vpop.eup %1035 }
 0x1ba   : > { %1014 = vmatmul.msk.f32.vlgmr.msrb.gmra.mxu3 %vm517_vm1, %v1253_v45 }
 0x1c0   : > { %997 = vmatmul.msk.f32.gmra.mxu0 %vm420_vm0, %v410_v43 }
 0x22d   : > { %v480_v0 = vpop.f32.mrf.mxu0 }
 0x22e   : > { %v481_v4 = vadd.f32 %v1208_v22, %v480_v0 }
 0x235   : > { %v483_v1 = vpop.f32.mrf.mxu0 }
 0x236   : > { %v484_v3 = vadd.f32 %v1208_v22, %v483_v1 }
 0x23d   : > { %v684_v6 = vpop.f32.mrf.mxu3  ;;  %v486_v16 = vpop.f32.mrf.mxu0 }
 0x23e   : > { %1037 = vrcp.f32 %v684_v6  ;;  %v698_v25 = vand.u32 2147483648, %v684_v6  ;;  %v696_v27 = vand.u32 2147483647, %v684_v6  ;;  %vm692_vm3 = vweird.f32 %v684_v6 }
 0x23f   : > { %1039 = vtanh.f32 %v620_v50 }
 0x240   : > { %v699_v30 = vor.u32 1.1754944e-38, %v698_v25  ;;  %vm697_vm5 = vcmp.eq.f32.partialorder %v696_v27, 8.507059e+37  ;;  %1041 = vtanh.f32 %v621_v53  ;;  %v891_v53 = vlaneseq }
 0x241   : > { %1043 = vtanh.f32 %v469_v60 }
 0x242   : > { %1045 = vtanh.f32 %v472_v33 }
 0x243   : > { %1047 = vtanh.f32 %v478_v2 }
 0x244   : > { %v1038_v15 = vpop.eup %1037  ;;  %1049 = vtanh.f32 %v484_v3 }
 0x245   : > { %v688_v17 = vmul.f32 %v1038_v15, %v684_v6  ;;  %vm693_vm2 = vweird.f32 %v1038_v15  ;;  %v1040_v54 = vpop.eup %1039  ;;  %1051 = vtanh.f32 %v481_v4 }
 0x246   : > { %vm694_vm4 = vmor %vm692_vm3, %vm693_vm2  ;;  %v1042_v57 = vpop.eup %1041  ;;  %1053 = vtanh.f32 %v475_v8 }
 0x247   : > { %v689_v20 = vsub.f32 1.0, %v688_v17  ;;  %v1044_v13 = vpop.eup %1043 }
 0x249   : > { %v690_v26 = vmul.f32 %v1038_v15, %v689_v20 }
 0x24b   : > { %v691_v29 = vadd.f32 %v1038_v15, %v690_v26 }
 0x24d   : > { %v695_v31 = vsel %vm694_vm4, %v1038_v15, %v691_v29  ;;  %v1046_v15 = vpop.eup %1045  ;;  %v487_v29 = vadd.f32 %v1208_v22, %v486_v16 }
 0x24e   : > { %v700_v34 = vsel %vm697_vm5, %v699_v30, %v695_v31  ;;  %v1048_v23 = vpop.eup %1047 }
 0x24f   : > { %v701_v35 = vmul.f32 %v1253_v45, %v700_v34  ;;  %v771_v45 = vld [vmem:[%s1437_s10 + $0x80] sm:$0xff]  ;;  %v1050_v28 = vpop.eup %1049  ;;  %1055 = vtanh.f32 %v487_v29 }
 0x250   : > { %822 = vmatpush.msra.mxu1 %v771_v45  ;;  %v1052_v36 = vpop.eup %1051  ;;  %1057 = vtanh.f32 %v490_v37 }
 0x251   : > { %1015 = vmatmul.msk.f32.vlgmr.msrb.gmra.mxu1 %vm517_vm1, %v701_v35  ;;  %1016 = vmatmul.msk.f32.vlgmr.msra.gmra.mxu2 %vm517_vm1, %v701_v35  ;;  %v1054_v39 = vpop.eup %1053 }
 0x255   : > { %v1056_v21 = vpop.eup %1055 }
 0x256   : > { %v1058_v22 = vpop.eup %1057 }
 0x2ce   : > { %v730_v55 = vpop.f32.mrf.mxu1 }
 0x2cf   : > { %v753_v56 = vmul.f32 %v1040_v54, %v730_v55 }
 0x2d1   : > { %803 = vmatmul.f32.vlgmr.msra.gmra.mxu3 %v753_v56 }
 0x2d4   : > { %v750_v58 = vpop.f32.mrf.mxu2 }
 0x2d5   : > { %v754_v59 = vmul.f32 %v1042_v57, %v750_v58  ;;  %v892_v57 = vand.u32 127, %v891_v53 }
 0x2d7   : > { %823 = vmatmul.f32.vlgmr.msra.gmra.mxu1 %v754_v59 }
 0x354   : > { %v804_v5 = vpop.f32.mrf.mxu3  ;;  %v824_v6 = vpop.f32.mrf.mxu1 }
 0x355   : > { %v825_v7 = vadd.f32 %v824_v6, %v804_v5 }
 0x357   : > { %v835_v9 = vperm.slane %v825_v7, 0  ;;  %v830_v10 = vrot.slane %v825_v7, 3  ;;  %v828_v11 = vrot.slane %v825_v7, 1  ;;  %v832_v12 = vrot.slane %v825_v7, 5 }
 0x358   : > { %v831_v14 = vrot.slane %v825_v7, 4  ;;  %v829_v20 = vrot.slane %v825_v7, 2  ;;  %v834_v42 = vrot.slane %v825_v7, 7  ;;  %v833_v43 = vrot.slane %v825_v7, 6 }
 0x359   : > { %v851_v17 = vmul.f32 %v1044_v13, %v835_v9  ;;  %v838_v18 = vperm.slane %v830_v10, 0  ;;  %v836_v19 = vperm.slane %v828_v11, 0  ;;  %v840_v27 = vperm.slane %v832_v12, 0 }
 0x35a   : > { %v839_v34 = vperm.slane %v831_v14, 0  ;;  %v837_v35 = vperm.slane %v829_v20, 0  ;;  %v842_v47 = vperm.slane %v834_v42, 0  ;;  %v841_v48 = vperm.slane %v833_v43, 0 }
 0x35b   : > { %v859_v24 = vsel %vm517_vm1, %v851_v17, 0.0  ;;  %v854_v25 = vmul.f32 %v1048_v23, %v838_v18  ;;  %v852_v26 = vmul.f32 %v1046_v15, %v836_v19  ;;  %v856_v38 = vmul.f32 %v1050_v28, %v840_v27 }
 0x35c   : > { %860 = vadd.xlane.f32.xlu0 %v859_v24  ;;  %v855_v40 = vmul.f32 %v1052_v36, %v839_v34  ;;  %v853_v41 = vmul.f32 %v1054_v39, %v837_v35  ;;  %v858_v49 = vmul.f32 %v1058_v22, %v842_v47  ;;  %v857_v50 = vmul.f32 %v1056_v21, %v841_v48 }
 0x35d   : > { %v868_v30 = vsel %vm517_vm1, %v854_v25, 0.0  ;;  %v862_v31 = vsel %vm517_vm1, %v852_v26, 0.0  ;;  %v874_v44 = vsel %vm517_vm1, %v856_v38, 0.0 }
 0x35e   : > { %869 = vadd.xlane.f32.xlu2 %v868_v30  ;;  %863 = vadd.xlane.f32.xlu1 %v862_v31  ;;  %v871_v45 = vsel %vm517_vm1, %v855_v40, 0.0  ;;  %v865_v46 = vsel %vm517_vm1, %v853_v41, 0.0  ;;  %v880_v51 = vsel %vm517_vm1, %v858_v49, 0.0  ;;  %v877_v52 = vsel %vm517_vm1, %v857_v50, 0.0 }
 0x364   : > { %875 = vadd.xlane.f32.xlu0 %v874_v44 }
 0x366   : > { %872 = vadd.xlane.f32.xlu2 %v871_v45  ;;  %866 = vadd.xlane.f32.xlu1 %v865_v46 }
 0x36e   : > { %881 = vadd.xlane.f32.xlu2 %v880_v51  ;;  %878 = vadd.xlane.f32.xlu1 %v877_v52 }
 0x3cf   : > { %v861_v56 = vpop.xlane.xlu0 %860 }
 0x3d0   : > { %v893_v59 = vperm.slane %v861_v56, %v892_v57 }
 0x3d1   : > { %v870_v54 = vpop.xlane.xlu2 %869  ;;  %v864_v55 = vpop.xlane.xlu1 %863 }
 0x3d2   : > { %v894_v58 = vperm.slane %v864_v55, %v892_v57  ;;  %v896_v63 = vperm.slane %v870_v54, %v892_v57 }
 0x3d4   : > { %v902_v0 = vsel %vm901_vm6, %v894_v58, %v893_v59 }
 0x3d7   : > { %v876_v1 = vpop.xlane.xlu0 %875 }
 0x3d8   : > { %v898_v4 = vperm.slane %v876_v1, %v892_v57 }
 0x3d9   : > { %v873_v61 = vpop.xlane.xlu2 %872  ;;  %v867_v62 = vpop.xlane.xlu1 %866 }
 0x3da   : > { %v895_v32 = vperm.slane %v867_v62, %v892_v57  ;;  %v897_v2 = vperm.slane %v873_v61, %v892_v57 }
 0x3dc   : > { %v904_v60 = vsel %vm903_vm7, %v895_v32, %v902_v0 }
 0x3dd   : > { %v906_v33 = vsel %vm905_vm8, %v896_v63, %v904_v60 }
 0x3de   : > { %v908_v3 = vsel %vm907_vm9, %v897_v2, %v906_v33 }
 0x3df   : > { %v910_v9 = vsel %vm909_vm10, %v898_v4, %v908_v3 }
 0x3e1   : > { %v882_v5 = vpop.xlane.xlu2 %881  ;;  %v879_v6 = vpop.xlane.xlu1 %878 }
 0x3e2   : > { %v900_v7 = vperm.slane %v882_v5, %v892_v57  ;;  %v899_v8 = vperm.slane %v879_v6, %v892_v57 }
 0x3e4   : > { %v912_v10 = vsel %vm911_vm11, %v899_v8, %v910_v9 }
 0x3e5   : > { %v914_v11 = vsel %vm913_vm12, %v900_v7, %v912_v10 }
 0x3e6   : > { %917 = vst.msk [vmem:[%s403_s24] sm:$0xff] %vm916_vm13, %v914_v11 }
 0x3e7 PF: > { %s21_s17 = sadd.s32 1, %s1065_s17  }
 0x3e8   : > { %p18_p5 = scmp.ge.s32.totalorder %s21_s17, 6  }
 0x3ea   :  { %20 = sbr.rel (!%p18_p5) target bundleno = 1 (0x1), region = 98 }

</bundles_post_ra>
